<compile_context>
chip_gen: v7x
topology: tpu7x:2x2x1
jax: 0.10.0
libtpu: 0.0.40
codegen_flags: <defaults>
</compile_context>

<pallas_src>
import functools

import jax
import jax.numpy as jnp
from jax import lax
from jax.experimental import pallas as pl
from jax.experimental.pallas import tpu as pltpu


def _round_up(x, m):
    return ((x + m - 1) // m) * m


def _snn_chunk_kernel(x_ref, w_ref, spk_ref, syn_ref, mem_ref, h_ref, *,
                      alpha, beta, t_chunk, b_tile, unroll):
    """One grid step = one (batch_tile, time_chunk).

    x_ref  : (t_chunk*b_tile, input_size)  matmul dtype
    w_ref  : (input_size, o_p)             matmul dtype
    spk_ref: (t_chunk*b_tile, o_p)         spike dtype (bf16 by default)
    syn/mem: (b_tile, o_p) f32 VMEM scratch, carried across time chunks
    h_ref  : (t_chunk*b_tile, o_p) f32 VMEM scratch; holds h for the chunk and
             is overwritten row-block by row-block with the spikes.
    """
    # Recurrent state restarts at the first time chunk of every batch tile.
    @pl.when(pl.program_id(1) == 0)
    def _():
        syn_ref[...] = jnp.zeros_like(syn_ref)
        mem_ref[...] = jnp.zeros_like(mem_ref)

    # One MXU matmul for the whole chunk; result lives in VMEM scratch so the
    # LIF loop only ever keeps a single time step of h in vregs.
    h_ref[...] = jnp.dot(x_ref[...], w_ref[...],
                         preferred_element_type=jnp.float32)

    def lif_step(t, carry):
        syn, mem = carry
        row = pl.multiple_of(t * b_tile, b_tile)
        h_t = h_ref[pl.ds(row, b_tile), :]
        spiked = mem > 1.0                    # == (mem - 1.0 > 0.0) in f32
        # Reuse the just-consumed h rows as the spike staging buffer.
        h_ref[pl.ds(row, b_tile), :] = spiked.astype(jnp.float32)
        new_mem = jnp.where(spiked, 0.0, beta * mem + syn)   # uses the OLD syn
        new_syn = alpha * syn + h_t
        return new_syn, new_mem

    syn, mem = lax.fori_loop(0, t_chunk, lif_step,
                             (syn_ref[...], mem_ref[...]), unroll=unroll)
    syn_ref[...] = syn
    mem_ref[...] = mem

    # Single dense, lane-aligned store of the whole chunk's spikes.
    spk_ref[...] = h_ref[...].astype(spk_ref.dtype)


def snn_recurrent_layer(x, weight, alpha, beta, *, t_chunk=None,
                        matmul_dtype=jnp.float32, spike_dtype=jnp.bfloat16):
    """x: (batch, nb_steps, input_size); weight: (output_size, input_size)
    (nn.Linear convention).  Returns spk: (batch, nb_steps, output_size) f32."""
    batch, nb_steps, input_size = x.shape
    output_size = weight.shape[0]

    matmul_dtype = jnp.dtype(matmul_dtype)
    spike_dtype = jnp.dtype(spike_dtype)
    in_bpe = matmul_dtype.itemsize
    spk_bpe = spike_dtype.itemsize

    # Sublane granularity: 8 rows for 32-bit operands, 16 for packed 16-bit.
    sublane = 16 if in_bpe == 2 else 8
    o_p = _round_up(output_size, 128)     # only the output lane dim is padded

    # Batch tiling: 2 independent tiles when batch is big enough, so the
    # leading "parallel" grid axis can use v7x's second TensorCore.
    batch_p = _round_up(batch, sublane)
    n_bt = 2 if batch_p >= 2 * sublane else 1
    batch_p = _round_up(batch_p, n_bt * sublane)
    b_tile = batch_p // n_bt

    # Per-generation VMEM budget (v7x: 64 MiB physical; leave headroom).
    try:
        phys_vmem = int(pltpu.get_tpu_info().vmem_capacity_bytes)
    except Exception:
        phys_vmem = 64 * 1024 * 1024      # assume the smallest (v7x) if unknown
    vmem_cap = max(32 * 1024 * 1024,
                   min(phys_vmem - 16 * 1024 * 1024, 96 * 1024 * 1024))

    unroll = 8
    if t_chunk is None:
        budget = vmem_cap // 2
        fixed = 2 * input_size * o_p * in_bpe + 2 * b_tile * o_p * 4
        per_step = b_tile * (2 * input_size * in_bpe + 2 * o_p * spk_bpe + o_p * 4)
        t_chunk = max(unroll, min(128, (budget - fixed) // per_step))
    t_chunk_max = max(unroll, (int(t_chunk) // unroll) * unroll)

    # Pick the chunk size (multiple of the LIF unroll) wasting the fewest
    # padded time steps, then the fewest grid steps.
    best = None
    for cand in range(unroll, t_chunk_max + 1, unroll):
        pad = _round_up(nb_steps, cand) - nb_steps
        key = (pad, _round_up(nb_steps, cand) // cand)
        if best is None or key < best[0]:
            best = (key, cand)
    t_chunk = best[1]
    nb_steps_p = _round_up(nb_steps, t_chunk)
    n_chunks = nb_steps_p // t_chunk
    rows = t_chunk * b_tile

    # Layout: (batch_tile, time * rows_in_tile, feature).  Zero padding keeps
    # padded batch rows / neurons silent; padded time steps are sliced off.
    x_p = jnp.pad(x.astype(jnp.float32),
                  ((0, batch_p - batch), (0, nb_steps_p - nb_steps), (0, 0)))
    x_p = x_p.reshape(n_bt, b_tile, nb_steps_p, input_size)
    x_p = jnp.transpose(x_p, (0, 2, 1, 3)).reshape(
        n_bt, nb_steps_p * b_tile, input_size).astype(matmul_dtype)

    w_p = jnp.pad(jnp.transpose(weight.astype(jnp.float32), (1, 0)),
                  ((0, 0), (0, o_p - output_size))).astype(matmul_dtype)

    kernel = functools.partial(_snn_chunk_kernel, alpha=float(alpha),
                               beta=float(beta), t_chunk=t_chunk,
                               b_tile=b_tile, unroll=unroll)

    vmem_est = (2 * rows * input_size * in_bpe     # x chunk, double buffered
                + 2 * input_size * o_p * in_bpe    # W (constant index -> 1 DMA)
                + 2 * rows * o_p * spk_bpe         # spk chunk, double buffered
                + rows * o_p * 4                   # h / spike staging scratch
                + 2 * b_tile * o_p * 4)            # syn + mem
    vmem_limit = int(min(vmem_cap, max(32 * 1024 * 1024, 2 * vmem_est)))

    spk = pl.pallas_call(
        kernel,
        out_shape=jax.ShapeDtypeStruct((n_bt, nb_steps_p * b_tile, o_p),
                                       spike_dtype),
        grid_spec=pltpu.PrefetchScalarGridSpec(
            num_scalar_prefetch=0,
            grid=(n_bt, n_chunks),                       # time innermost
            in_specs=[
                pl.BlockSpec((None, rows, input_size), lambda b, c: (b, c, 0)),
                pl.BlockSpec((input_size, o_p), lambda b, c: (0, 0)),
            ],
            out_specs=pl.BlockSpec((None, rows, o_p), lambda b, c: (b, c, 0)),
            scratch_shapes=[
                pltpu.VMEM((b_tile, o_p), jnp.float32),   # syn
                pltpu.VMEM((b_tile, o_p), jnp.float32),   # mem
                pltpu.VMEM((rows, o_p), jnp.float32),     # h / spike staging
            ],
        ),
        compiler_params=pltpu.CompilerParams(
            dimension_semantics=("parallel", "arbitrary"),
            vmem_limit_bytes=vmem_limit,
        ),
    )(x_p, w_p)

    # Undo the tiling / padding and return (batch, nb_steps, output_size) f32.
    spk = spk.reshape(n_bt, nb_steps_p, b_tile, o_p)
    spk = jnp.transpose(spk, (0, 2, 1, 3)).reshape(batch_p, nb_steps_p, o_p)
    return spk[:batch, :nb_steps, :output_size].astype(jnp.float32)


def snn_reference(x, weight, alpha, beta):
    """Pure-JAX reference with identical semantics to the PyTorch module."""
    batch, nb_steps, _ = x.shape
    output_size = weight.shape[0]
    h = jnp.einsum("bti,oi->bto", x, weight,
                   precision=jax.lax.Precision.HIGHEST)
    syn = jnp.zeros((batch, output_size), jnp.float32)
    mem = jnp.zeros((batch, output_size), jnp.float32)

    def step(carry, h_t):
        syn, mem = carry
        spk = (mem - 1.0 > 0.0).astype(jnp.float32)
        new_syn = alpha * syn + h_t
        new_mem = (beta * mem + syn) * (1.0 - spk)
        return (new_syn, new_mem), spk

    (_, _), spk_t = jax.lax.scan(step, (syn, mem), jnp.transpose(h, (1, 0, 2)))
    return jnp.transpose(spk_t, (1, 0, 2))


# TODO(synk): only the forward spike path is implemented; the SurrGradSpike
# surrogate gradient (backward) is not expressed in this kernel.

if __name__ == "__main__":
    alpha = 0.9
    beta = 0.85
    key = jax.random.PRNGKey(0)

    def make_case(k, batch, nb_steps, input_size, output_size):
        kx, kw = jax.random.split(k)
        x = jax.random.uniform(kx, (batch, nb_steps, input_size),
                               jnp.float32, 0.0, 2.0)
        bound = 1.0 / (input_size ** 0.5)
        w = jax.random.uniform(kw, (output_size, input_size),
                               jnp.float32, -bound, bound)
        return x, w

    # --- primary (small) test, matching the module's intended shapes ---
    k1, k2, k3 = jax.random.split(key, 3)
    x, w = make_case(k1, batch=2, nb_steps=8, input_size=16, output_size=32)
    spk = snn_recurrent_layer(x, w, alpha, beta)
    jax.block_until_ready(spk)
    spk_ref = snn_reference(x, w, alpha, beta)
    assert spk.shape == (2, 8, 32)
    assert jnp.allclose(spk, spk_ref, atol=1e-5, rtol=1e-5)

    # --- multiple time chunks: state carried across grid steps ---
    x2, w2 = make_case(k2, batch=3, nb_steps=40, input_size=20, output_size=48)
    spk2 = snn_recurrent_layer(x2, w2, alpha, beta, t_chunk=8)
    jax.block_until_ready(spk2)
    spk2_ref = snn_reference(x2, w2, alpha, beta)
    assert spk2.shape == (3, 40, 48)
    assert jnp.allclose(spk2, spk2_ref, atol=1e-5, rtol=1e-5)

    # --- batch tiling (parallel grid axis) + padding on every axis ---
    x3, w3 = make_case(k3, batch=18, nb_steps=25, input_size=24, output_size=40)
    spk3 = snn_recurrent_layer(x3, w3, alpha, beta)
    jax.block_until_ready(spk3)
    spk3_ref = snn_reference(x3, w3, alpha, beta)
    assert spk3.shape == (18, 25, 40)
    assert jnp.allclose(spk3, spk3_ref, atol=1e-5, rtol=1e-5)

    print("KERNEL_OK")
</pallas_src>

<mosaic_0001>
module attributes {stable_mosaic.version = 11 : i64} {
  func.func @_snn_chunk_kernel(%arg0: i32, %arg1: i32, %arg2: memref<1x64x16xf32, #tpu.memory_space<vmem>>, %arg3: memref<16x128xf32, #tpu.memory_space<vmem>>, %arg4: memref<1x64x128xbf16, #tpu.memory_space<vmem>>, %arg5: memref<8x128xf32, #tpu.memory_space<vmem>>, %arg6: memref<8x128xf32, #tpu.memory_space<vmem>>, %arg7: memref<64x128xf32, #tpu.memory_space<vmem>>) attributes {dimension_semantics = [#tpu.dimension_semantics<parallel>, #tpu.dimension_semantics<arbitrary>], iteration_bounds = array<i64: 1, 1>, scalar_prefetch = 0 : i64, scratch_operands = 3 : i64, tpu.core_type = #tpu.core_type<tc>, window_params = [{transform_indices = @transform_0, window_bounds = array<i64: 1, 64, 16>}, {pipeline_mode = #tpu.pipeline_mode<synchronous>, transform_indices = @transform_1, window_bounds = array<i64: 16, 128>}, {transform_indices = @transform_2, window_bounds = array<i64: 1, 64, 128>}]} {
    %c0_i32 = arith.constant 0 : i32
    %0 = arith.cmpi eq, %arg1, %c0_i32 : i32
    %1 = arith.extui %0 : i1 to i32
    %c0_i32_0 = arith.constant 0 : i32
    %2 = arith.cmpi ne, %1, %c0_i32_0 : i32
    scf.if %2 {
      %cst_77 = arith.constant 0.000000e+00 : f32
      %161 = vector.broadcast %cst_77 : f32 to vector<8x128xf32>
      %c0_78 = arith.constant 0 : index
      %c0_79 = arith.constant 0 : index
      %162 = vector.load %arg5[%c0_78, %c0_79] : memref<8x128xf32, #tpu.memory_space<vmem>>, vector<8x128xf32>
      tpu.vector_store %arg5[%c0_78, %c0_79], %161 {strides = array<i32>} : memref<8x128xf32, #tpu.memory_space<vmem>>, vector<8x128xf32>,
      %cst_80 = arith.constant 0.000000e+00 : f32
      %163 = vector.broadcast %cst_80 : f32 to vector<8x128xf32>
      %c0_81 = arith.constant 0 : index
      %c0_82 = arith.constant 0 : index
      %164 = vector.load %arg6[%c0_81, %c0_82] : memref<8x128xf32, #tpu.memory_space<vmem>>, vector<8x128xf32>
      tpu.vector_store %arg6[%c0_81, %c0_82], %163 {strides = array<i32>} : memref<8x128xf32, #tpu.memory_space<vmem>>, vector<8x128xf32>,
    } else {
    }
    %c0 = arith.constant 0 : index
    %c0_1 = arith.constant 0 : index
    %c0_2 = arith.constant 0 : index
    %3 = vector.load %arg2[%c0, %c0_1, %c0_2] : memref<1x64x16xf32, #tpu.memory_space<vmem>>, vector<1x64x16xf32>
    %4 = vector.shape_cast %3 : vector<1x64x16xf32> to vector<64x16xf32>
    %c0_3 = arith.constant 0 : index
    %c0_4 = arith.constant 0 : index
    %5 = vector.load %arg3[%c0_3, %c0_4] : memref<16x128xf32, #tpu.memory_space<vmem>>, vector<16x128xf32>
    %cst = arith.constant dense<0.000000e+00> : vector<64x128xf32>
    %6 = tpu.matmul %4, %5, %cst {dimension_numbers = #tpu.dot_dimension_numbers<[1], [0], [0], [1], [0, 0, 1, 1], [], []>} : vector<64x16xf32>, vector<16x128xf32>, vector<64x128xf32> -> vector<64x128xf32>
    %c0_5 = arith.constant 0 : index
    %c0_6 = arith.constant 0 : index
    %7 = vector.load %arg7[%c0_5, %c0_6] : memref<64x128xf32, #tpu.memory_space<vmem>>, vector<64x128xf32>
    tpu.vector_store %arg7[%c0_5, %c0_6], %6 {strides = array<i32>} : memref<64x128xf32, #tpu.memory_space<vmem>>, vector<64x128xf32>,
    %c0_7 = arith.constant 0 : index
    %c0_8 = arith.constant 0 : index
    %8 = vector.load %arg5[%c0_7, %c0_8] : memref<8x128xf32, #tpu.memory_space<vmem>>, vector<8x128xf32>
    %c0_9 = arith.constant 0 : index
    %c0_10 = arith.constant 0 : index
    %9 = vector.load %arg6[%c0_9, %c0_10] : memref<8x128xf32, #tpu.memory_space<vmem>>, vector<8x128xf32>
    %c0_i32_11 = arith.constant 0 : i32
    %c8_i32 = arith.constant 8 : i32
    %10 = arith.muli %c0_i32_11, %c8_i32 : i32
    %11 = tpu.assume_multiple %10, 8 : i32
    %12 = arith.index_cast %11 : i32 to index
    %c0_12 = arith.constant 0 : index
    %13 = vector.load %arg7[%12, %c0_12] : memref<64x128xf32, #tpu.memory_space<vmem>>, vector<8x128xf32>
    %cst_13 = arith.constant 1.000000e+00 : f32
    %14 = vector.broadcast %cst_13 : f32 to vector<8x128xf32>
    %15 = arith.cmpf ogt, %9, %14 : vector<8x128xf32>
    %16 = arith.extui %15 : vector<8x128xi1> to vector<8x128xi32>
    %17 = arith.sitofp %16 : vector<8x128xi32> to vector<8x128xf32>
    %18 = arith.index_cast %11 : i32 to index
    %c0_14 = arith.constant 0 : index
    %19 = vector.load %arg7[%18, %c0_14] : memref<64x128xf32, #tpu.memory_space<vmem>>, vector<8x128xf32>
    tpu.vector_store %arg7[%18, %c0_14], %17 {strides = array<i32>} : memref<64x128xf32, #tpu.memory_space<vmem>>, vector<8x128xf32>,
    %cst_15 = arith.constant 8.500000e-01 : f32
    %20 = vector.broadcast %cst_15 : f32 to vector<8x128xf32>
    %21 = arith.mulf %20, %9 : vector<8x128xf32>
    %22 = arith.addf %21, %8 : vector<8x128xf32>
    %cst_16 = arith.constant 0.000000e+00 : f32
    %23 = vector.broadcast %cst_16 : f32 to vector<8x128xf32>
    %24 = arith.select %15, %23, %22 : vector<8x128xi1>, vector<8x128xf32>
    %cst_17 = arith.constant 0.899999976 : f32
    %25 = vector.broadcast %cst_17 : f32 to vector<8x128xf32>
    %26 = arith.mulf %25, %8 : vector<8x128xf32>
    %27 = arith.addf %26, %13 : vector<8x128xf32>
    %c1_i32 = arith.constant 1 : i32
    %c8_i32_18 = arith.constant 8 : i32
    %28 = arith.muli %c1_i32, %c8_i32_18 : i32
    %29 = tpu.assume_multiple %28, 8 : i32
    %30 = arith.index_cast %29 : i32 to index
    %c0_19 = arith.constant 0 : index
    %31 = vector.load %arg7[%30, %c0_19] : memref<64x128xf32, #tpu.memory_space<vmem>>, vector<8x128xf32>
    %cst_20 = arith.constant 1.000000e+00 : f32
    %32 = vector.broadcast %cst_20 : f32 to vector<8x128xf32>
    %33 = arith.cmpf ogt, %24, %32 : vector<8x128xf32>
    %34 = arith.extui %33 : vector<8x128xi1> to vector<8x128xi32>
    %35 = arith.sitofp %34 : vector<8x128xi32> to vector<8x128xf32>
    %36 = arith.index_cast %29 : i32 to index
    %c0_21 = arith.constant 0 : index
    %37 = vector.load %arg7[%36, %c0_21] : memref<64x128xf32, #tpu.memory_space<vmem>>, vector<8x128xf32>
    tpu.vector_store %arg7[%36, %c0_21], %35 {strides = array<i32>} : memref<64x128xf32, #tpu.memory_space<vmem>>, vector<8x128xf32>,
    %cst_22 = arith.constant 8.500000e-01 : f32
    %38 = vector.broadcast %cst_22 : f32 to vector<8x128xf32>
    %39 = arith.mulf %38, %24 : vector<8x128xf32>
    %40 = arith.addf %39, %27 : vector<8x128xf32>
    %cst_23 = arith.constant 0.000000e+00 : f32
    %41 = vector.broadcast %cst_23 : f32 to vector<8x128xf32>
    %42 = arith.select %33, %41, %40 : vector<8x128xi1>, vector<8x128xf32>
    %cst_24 = arith.constant 0.899999976 : f32
    %43 = vector.broadcast %cst_24 : f32 to vector<8x128xf32>
    %44 = arith.mulf %43, %27 : vector<8x128xf32>
    %45 = arith.addf %44, %31 : vector<8x128xf32>
    %c2_i32 = arith.constant 2 : i32
    %c8_i32_25 = arith.constant 8 : i32
    %46 = arith.muli %c2_i32, %c8_i32_25 : i32
    %47 = tpu.assume_multiple %46, 8 : i32
    %48 = arith.index_cast %47 : i32 to index
    %c0_26 = arith.constant 0 : index
    %49 = vector.load %arg7[%48, %c0_26] : memref<64x128xf32, #tpu.memory_space<vmem>>, vector<8x128xf32>
    %cst_27 = arith.constant 1.000000e+00 : f32
    %50 = vector.broadcast %cst_27 : f32 to vector<8x128xf32>
    %51 = arith.cmpf ogt, %42, %50 : vector<8x128xf32>
    %52 = arith.extui %51 : vector<8x128xi1> to vector<8x128xi32>
    %53 = arith.sitofp %52 : vector<8x128xi32> to vector<8x128xf32>
    %54 = arith.index_cast %47 : i32 to index
    %c0_28 = arith.constant 0 : index
    %55 = vector.load %arg7[%54, %c0_28] : memref<64x128xf32, #tpu.memory_space<vmem>>, vector<8x128xf32>
    tpu.vector_store %arg7[%54, %c0_28], %53 {strides = array<i32>} : memref<64x128xf32, #tpu.memory_space<vmem>>, vector<8x128xf32>,
    %cst_29 = arith.constant 8.500000e-01 : f32
    %56 = vector.broadcast %cst_29 : f32 to vector<8x128xf32>
    %57 = arith.mulf %56, %42 : vector<8x128xf32>
    %58 = arith.addf %57, %45 : vector<8x128xf32>
    %cst_30 = arith.constant 0.000000e+00 : f32
    %59 = vector.broadcast %cst_30 : f32 to vector<8x128xf32>
    %60 = arith.select %51, %59, %58 : vector<8x128xi1>, vector<8x128xf32>
    %cst_31 = arith.constant 0.899999976 : f32
    %61 = vector.broadcast %cst_31 : f32 to vector<8x128xf32>
    %62 = arith.mulf %61, %45 : vector<8x128xf32>
    %63 = arith.addf %62, %49 : vector<8x128xf32>
    %c3_i32 = arith.constant 3 : i32
    %c8_i32_32 = arith.constant 8 : i32
    %64 = arith.muli %c3_i32, %c8_i32_32 : i32
    %65 = tpu.assume_multiple %64, 8 : i32
    %66 = arith.index_cast %65 : i32 to index
    %c0_33 = arith.constant 0 : index
    %67 = vector.load %arg7[%66, %c0_33] : memref<64x128xf32, #tpu.memory_space<vmem>>, vector<8x128xf32>
    %cst_34 = arith.constant 1.000000e+00 : f32
    %68 = vector.broadcast %cst_34 : f32 to vector<8x128xf32>
    %69 = arith.cmpf ogt, %60, %68 : vector<8x128xf32>
    %70 = arith.extui %69 : vector<8x128xi1> to vector<8x128xi32>
    %71 = arith.sitofp %70 : vector<8x128xi32> to vector<8x128xf32>
    %72 = arith.index_cast %65 : i32 to index
    %c0_35 = arith.constant 0 : index
    %73 = vector.load %arg7[%72, %c0_35] : memref<64x128xf32, #tpu.memory_space<vmem>>, vector<8x128xf32>
    tpu.vector_store %arg7[%72, %c0_35], %71 {strides = array<i32>} : memref<64x128xf32, #tpu.memory_space<vmem>>, vector<8x128xf32>,
    %cst_36 = arith.constant 8.500000e-01 : f32
    %74 = vector.broadcast %cst_36 : f32 to vector<8x128xf32>
    %75 = arith.mulf %74, %60 : vector<8x128xf32>
    %76 = arith.addf %75, %63 : vector<8x128xf32>
    %cst_37 = arith.constant 0.000000e+00 : f32
    %77 = vector.broadcast %cst_37 : f32 to vector<8x128xf32>
    %78 = arith.select %69, %77, %76 : vector<8x128xi1>, vector<8x128xf32>
    %cst_38 = arith.constant 0.899999976 : f32
    %79 = vector.broadcast %cst_38 : f32 to vector<8x128xf32>
    %80 = arith.mulf %79, %63 : vector<8x128xf32>
    %81 = arith.addf %80, %67 : vector<8x128xf32>
    %c4_i32 = arith.constant 4 : i32
    %c8_i32_39 = arith.constant 8 : i32
    %82 = arith.muli %c4_i32, %c8_i32_39 : i32
    %83 = tpu.assume_multiple %82, 8 : i32
    %84 = arith.index_cast %83 : i32 to index
    %c0_40 = arith.constant 0 : index
    %85 = vector.load %arg7[%84, %c0_40] : memref<64x128xf32, #tpu.memory_space<vmem>>, vector<8x128xf32>
    %cst_41 = arith.constant 1.000000e+00 : f32
    %86 = vector.broadcast %cst_41 : f32 to vector<8x128xf32>
    %87 = arith.cmpf ogt, %78, %86 : vector<8x128xf32>
    %88 = arith.extui %87 : vector<8x128xi1> to vector<8x128xi32>
    %89 = arith.sitofp %88 : vector<8x128xi32> to vector<8x128xf32>
    %90 = arith.index_cast %83 : i32 to index
    %c0_42 = arith.constant 0 : index
    %91 = vector.load %arg7[%90, %c0_42] : memref<64x128xf32, #tpu.memory_space<vmem>>, vector<8x128xf32>
    tpu.vector_store %arg7[%90, %c0_42], %89 {strides = array<i32>} : memref<64x128xf32, #tpu.memory_space<vmem>>, vector<8x128xf32>,
    %cst_43 = arith.constant 8.500000e-01 : f32
    %92 = vector.broadcast %cst_43 : f32 to vector<8x128xf32>
    %93 = arith.mulf %92, %78 : vector<8x128xf32>
    %94 = arith.addf %93, %81 : vector<8x128xf32>
    %cst_44 = arith.constant 0.000000e+00 : f32
    %95 = vector.broadcast %cst_44 : f32 to vector<8x128xf32>
    %96 = arith.select %87, %95, %94 : vector<8x128xi1>, vector<8x128xf32>
    %cst_45 = arith.constant 0.899999976 : f32
    %97 = vector.broadcast %cst_45 : f32 to vector<8x128xf32>
    %98 = arith.mulf %97, %81 : vector<8x128xf32>
    %99 = arith.addf %98, %85 : vector<8x128xf32>
    %c5_i32 = arith.constant 5 : i32
    %c8_i32_46 = arith.constant 8 : i32
    %100 = arith.muli %c5_i32, %c8_i32_46 : i32
    %101 = tpu.assume_multiple %100, 8 : i32
    %102 = arith.index_cast %101 : i32 to index
    %c0_47 = arith.constant 0 : index
    %103 = vector.load %arg7[%102, %c0_47] : memref<64x128xf32, #tpu.memory_space<vmem>>, vector<8x128xf32>
    %cst_48 = arith.constant 1.000000e+00 : f32
    %104 = vector.broadcast %cst_48 : f32 to vector<8x128xf32>
    %105 = arith.cmpf ogt, %96, %104 : vector<8x128xf32>
    %106 = arith.extui %105 : vector<8x128xi1> to vector<8x128xi32>
    %107 = arith.sitofp %106 : vector<8x128xi32> to vector<8x128xf32>
    %108 = arith.index_cast %101 : i32 to index
    %c0_49 = arith.constant 0 : index
    %109 = vector.load %arg7[%108, %c0_49] : memref<64x128xf32, #tpu.memory_space<vmem>>, vector<8x128xf32>
    tpu.vector_store %arg7[%108, %c0_49], %107 {strides = array<i32>} : memref<64x128xf32, #tpu.memory_space<vmem>>, vector<8x128xf32>,
    %cst_50 = arith.constant 8.500000e-01 : f32
    %110 = vector.broadcast %cst_50 : f32 to vector<8x128xf32>
    %111 = arith.mulf %110, %96 : vector<8x128xf32>
    %112 = arith.addf %111, %99 : vector<8x128xf32>
    %cst_51 = arith.constant 0.000000e+00 : f32
    %113 = vector.broadcast %cst_51 : f32 to vector<8x128xf32>
    %114 = arith.select %105, %113, %112 : vector<8x128xi1>, vector<8x128xf32>
    %cst_52 = arith.constant 0.899999976 : f32
    %115 = vector.broadcast %cst_52 : f32 to vector<8x128xf32>
    %116 = arith.mulf %115, %99 : vector<8x128xf32>
    %117 = arith.addf %116, %103 : vector<8x128xf32>
    %c6_i32 = arith.constant 6 : i32
    %c8_i32_53 = arith.constant 8 : i32
    %118 = arith.muli %c6_i32, %c8_i32_53 : i32
    %119 = tpu.assume_multiple %118, 8 : i32
    %120 = arith.index_cast %119 : i32 to index
    %c0_54 = arith.constant 0 : index
    %121 = vector.load %arg7[%120, %c0_54] : memref<64x128xf32, #tpu.memory_space<vmem>>, vector<8x128xf32>
    %cst_55 = arith.constant 1.000000e+00 : f32
    %122 = vector.broadcast %cst_55 : f32 to vector<8x128xf32>
    %123 = arith.cmpf ogt, %114, %122 : vector<8x128xf32>
    %124 = arith.extui %123 : vector<8x128xi1> to vector<8x128xi32>
    %125 = arith.sitofp %124 : vector<8x128xi32> to vector<8x128xf32>
    %126 = arith.index_cast %119 : i32 to index
    %c0_56 = arith.constant 0 : index
    %127 = vector.load %arg7[%126, %c0_56] : memref<64x128xf32, #tpu.memory_space<vmem>>, vector<8x128xf32>
    tpu.vector_store %arg7[%126, %c0_56], %125 {strides = array<i32>} : memref<64x128xf32, #tpu.memory_space<vmem>>, vector<8x128xf32>,
    %cst_57 = arith.constant 8.500000e-01 : f32
    %128 = vector.broadcast %cst_57 : f32 to vector<8x128xf32>
    %129 = arith.mulf %128, %114 : vector<8x128xf32>
    %130 = arith.addf %129, %117 : vector<8x128xf32>
    %cst_58 = arith.constant 0.000000e+00 : f32
    %131 = vector.broadcast %cst_58 : f32 to vector<8x128xf32>
    %132 = arith.select %123, %131, %130 : vector<8x128xi1>, vector<8x128xf32>
    %cst_59 = arith.constant 0.899999976 : f32
    %133 = vector.broadcast %cst_59 : f32 to vector<8x128xf32>
    %134 = arith.mulf %133, %117 : vector<8x128xf32>
    %135 = arith.addf %134, %121 : vector<8x128xf32>
    %c7_i32 = arith.constant 7 : i32
    %c8_i32_60 = arith.constant 8 : i32
    %136 = arith.muli %c7_i32, %c8_i32_60 : i32
    %137 = tpu.assume_multiple %136, 8 : i32
    %138 = arith.index_cast %137 : i32 to index
    %c0_61 = arith.constant 0 : index
    %139 = vector.load %arg7[%138, %c0_61] : memref<64x128xf32, #tpu.memory_space<vmem>>, vector<8x128xf32>
    %cst_62 = arith.constant 1.000000e+00 : f32
    %140 = vector.broadcast %cst_62 : f32 to vector<8x128xf32>
    %141 = arith.cmpf ogt, %132, %140 : vector<8x128xf32>
    %142 = arith.extui %141 : vector<8x128xi1> to vector<8x128xi32>
    %143 = arith.sitofp %142 : vector<8x128xi32> to vector<8x128xf32>
    %144 = arith.index_cast %137 : i32 to index
    %c0_63 = arith.constant 0 : index
    %145 = vector.load %arg7[%144, %c0_63] : memref<64x128xf32, #tpu.memory_space<vmem>>, vector<8x128xf32>
    tpu.vector_store %arg7[%144, %c0_63], %143 {strides = array<i32>} : memref<64x128xf32, #tpu.memory_space<vmem>>, vector<8x128xf32>,
    %cst_64 = arith.constant 8.500000e-01 : f32
    %146 = vector.broadcast %cst_64 : f32 to vector<8x128xf32>
    %147 = arith.mulf %146, %132 : vector<8x128xf32>
    %148 = arith.addf %147, %135 : vector<8x128xf32>
    %cst_65 = arith.constant 0.000000e+00 : f32
    %149 = vector.broadcast %cst_65 : f32 to vector<8x128xf32>
    %150 = arith.select %141, %149, %148 : vector<8x128xi1>, vector<8x128xf32>
    %cst_66 = arith.constant 0.899999976 : f32
    %151 = vector.broadcast %cst_66 : f32 to vector<8x128xf32>
    %152 = arith.mulf %151, %135 : vector<8x128xf32>
    %153 = arith.addf %152, %139 : vector<8x128xf32>
    %c8_i32_67 = arith.constant 8 : i32
    %c0_68 = arith.constant 0 : index
    %c0_69 = arith.constant 0 : index
    %154 = vector.load %arg5[%c0_68, %c0_69] : memref<8x128xf32, #tpu.memory_space<vmem>>, vector<8x128xf32>
    tpu.vector_store %arg5[%c0_68, %c0_69], %153 {strides = array<i32>} : memref<8x128xf32, #tpu.memory_space<vmem>>, vector<8x128xf32>,
    %c0_70 = arith.constant 0 : index
    %c0_71 = arith.constant 0 : index
    %155 = vector.load %arg6[%c0_70, %c0_71] : memref<8x128xf32, #tpu.memory_space<vmem>>, vector<8x128xf32>
    tpu.vector_store %arg6[%c0_70, %c0_71], %150 {strides = array<i32>} : memref<8x128xf32, #tpu.memory_space<vmem>>, vector<8x128xf32>,
    %c0_72 = arith.constant 0 : index
    %c0_73 = arith.constant 0 : index
    %156 = vector.load %arg7[%c0_72, %c0_73] : memref<64x128xf32, #tpu.memory_space<vmem>>, vector<64x128xf32>
    %157 = arith.truncf %156 : vector<64x128xf32> to vector<64x128xbf16>
    %c0_74 = arith.constant 0 : index
    %c0_75 = arith.constant 0 : index
    %c0_76 = arith.constant 0 : index
    %158 = vector.load %arg4[%c0_74, %c0_75, %c0_76] : memref<1x64x128xbf16, #tpu.memory_space<vmem>>, vector<1x64x128xbf16>
    %159 = vector.shape_cast %158 : vector<1x64x128xbf16> to vector<64x128xbf16>
    %160 = vector.shape_cast %157 : vector<64x128xbf16> to vector<1x64x128xbf16>
    tpu.vector_store %arg4[%c0_74, %c0_75, %c0_76], %160 {strides = array<i32>} : memref<1x64x128xbf16, #tpu.memory_space<vmem>>, vector<1x64x128xbf16>,
    return
  }
  func.func @transform_0(%arg0: i32, %arg1: i32) -> (i32, i32, i32) {
    %c0_i32 = arith.constant 0 : i32
    %c0_i32_0 = arith.constant 0 : i32
    return %arg0, %arg1, %c0_i32 : i32, i32, i32
  }
  func.func @transform_1(%arg0: i32, %arg1: i32) -> (i32, i32) {
    %c0_i32 = arith.constant 0 : i32
    %c0_i32_0 = arith.constant 0 : i32
    %c0_i32_1 = arith.constant 0 : i32
    return %c0_i32, %c0_i32_0 : i32, i32
  }
  func.func @transform_2(%arg0: i32, %arg1: i32) -> (i32, i32, i32) {
    %c0_i32 = arith.constant 0 : i32
    %c0_i32_0 = arith.constant 0 : i32
    return %arg0, %arg1, %c0_i32 : i32, i32, i32
  }
}

</mosaic_0001>

<bundles_post_ra>
// kernel: tpu_custom_call.1
= control target key start
LH: loop header
LB: loop body
LE: loop exit
PB: predicated region body
PF: predicated region fallthrough
CT: control target
= control target key end

     0   :  { %vm28_vm0 = vcmask 130048   ;;  %s507_s0 = inlined_call_operand.vmem [shape: f32[1,64,16], index: 0, kind: input, shape index: {}]   ;;  %s508_s1 = inlined_call_operand.vmem [shape: f32[16,128], index: 1, kind: input, shape index: {}]   ;;  %s509_s2 = inlined_call_operand.hbm [shape: bf16[1,64,128], index: 2, kind: output, shape index: {}]  }
   0x1   :  { %v26_v0 = vld [vmem:[%s508_s1] sm:$0xff]  ;;  %v27_v1 = vld [vmem:[%s508_s1 + $0x8] sm:$0xff] }
   0x2   :  { %v18_v2 = vld [vmem:[%s507_s0] sm:$0xff]  ;;  %v402_v3 = vpack.c.bf16 %v27_v1, %v26_v0 }
   0x3   :  { %390 = vmatprep.mubr.msk.f32.mxu0 %vm28_vm0, %v18_v2  ;;  %v22_v4 = vld [vmem:[%s507_s0 + $0x20] sm:$0xff] }
   0x4   :  { %403 = vmatprep.subr.bf16.mxu0 %v402_v3  ;;  %406 = vmatprep.subr.bf16.mxu1 %v402_v3 }
   0x5   :  { %7 = vsyncpa [#allocation6], 0  ;;  %405 = vmatpush3.bf16.msra.mxu0 %v402_v3  ;;  %v19_v5 = vld [vmem:[%s507_s0 + $0x8] sm:$0xff]  ;;  %407 = vmatpush3.bf16.msra.mxu1 %v402_v3  ;;  %v20_v7 = vld [vmem:[%s507_s0 + $0x10] sm:$0xff]  ;;  %v437_v11 = vmov 0.0|0.0   ;;  %v438_v28 = vmov 0.0  }
   0x6   :  { %v23_v6 = vld [vmem:[%s507_s0 + $0x28] sm:$0xff]  ;;  %396 = vmatprep.mubr.msk.f32.mxu1 %vm28_vm0, %v22_v4  ;;  %v24_v8 = vld [vmem:[%s507_s0 + $0x30] sm:$0xff]  ;;  %v21_v9 = vld [vmem:[%s507_s0 + $0x18] sm:$0xff]  ;;  %357 = vst [vmem:[#allocation5] sm:$0xff] %v437_v11  }
   0x7   :  { %v25_v10 = vld [vmem:[%s507_s0 + $0x38] sm:$0xff]  ;;  %s439_s0 = smov [#allocation5]  }
   0x8   :  { %391 = vmatmul.mubr.msk.f32.vlgmr.msra.gmra.mrb[0].mxu0 %vm28_vm0, %v19_v5  ;;  %397 = vmatmul.mubr.msk.f32.vlgmr.msra.gmra.mrb[0].mxu1 %vm28_vm0, %v23_v6  ;;  %s310_s28 = sshll.u32 %s439_s0, 4  ;;  %s311_s28 = int_to_ptr.vmem [resolvable:$true] %s310_s28 }
   0x9   :  { %393 = vmatprep.mubr.msk.f32.mxu0 %vm28_vm0, %v20_v7  ;;  %399 = vmatprep.mubr.msk.f32.mxu1 %vm28_vm0, %v24_v8  ;;  %s413_s29 = scalar_lea.vmem %s311_s28, 512  ;;  %p418_p1 = scmp.lt.s32.totalorder %s311_s28, %s311_s28 }
   0xa   :  { %p414_p0 = scmp.ne.s32.totalorder %s311_s28, %s413_s29  ;;  %p419_p2 = scmp.lt.s32.totalorder %s413_s29, %s413_s29 }
   0xc   :  { %394 = vmatmul.mubr.msk.f32.gmra.mrb[2].mxu0 %vm28_vm0, %v21_v9  ;;  %400 = vmatmul.mubr.msk.f32.gmra.mrb[2].mxu1 %vm28_vm0, %v25_v10  ;;  %p420_p3 = por %p419_p2, %p418_p1 }
   0xe   :  { %p421_p4 = pnand %p420_p3, %p414_p0 }
  0xdb   :  { %v392_v12 = vpop.f32.mrb[0].mxu0  ;;  %v398_v13 = vpop.f32.mrb[0].mxu1 }
  0xdc   :  { %v119_v14 = vpop.f32.mrb[1].mxu0  ;;  %v139_v15 = vpop.f32.mrb[1].mxu1 }
  0xdd   :  { %v187_v16 = vmul.f32 0.9, %v119_v14  ;;  %v195_v18 = vmul.f32 0.85, %v119_v14  ;;  %vm191_vm1 = vcmp.gt.f32.partialorder %v119_v14, 1.0 }
  0xde   :  { %v331_v29 = vsel %vm191_vm1, 1.0, %v438_v28 }
  0xdf   :  { %v188_v17 = vadd.f32 %v392_v12, %v187_v16  ;;  %v395_v19 = vpop.f32.mrb[2].mxu0  ;;  %v401_v20 = vpop.f32.mrb[2].mxu1 }
  0xe0   :  { %v129_v21 = vpop.f32.mrb[3].mxu0  ;;  %v149_v22 = vpop.f32.mrb[3].mxu1 }
  0xe1   :  { %v196_v23 = vadd.f32 %v195_v18, %v188_v17  ;;  %v198_v24 = vmul.f32 0.9, %v188_v17 }
  0xe3   :  { %v197_v25 = vsel %vm191_vm1, 0.0, %v196_v23  ;;  %v199_v26 = vadd.f32 %v198_v24, %v129_v21 }
  0xe4   :  { %vm202_vm2 = vcmp.gt.f32.partialorder %v197_v25, 1.0  ;;  %v206_v27 = vmul.f32 0.85, %v197_v25 }
  0xe5   :  { %v332_v30 = vsel %vm202_vm2, 1.0, %v438_v28  ;;  %v209_v31 = vmul.f32 0.9, %v199_v26 }
  0xe6   :  { %v361_v32 = vpack.c.bf16 %v332_v30, %v331_v29  ;;  %v207_v33 = vadd.f32 %v206_v27, %v199_v26 }
  0xe7   :  { %v210_v34 = vadd.f32 %v395_v19, %v209_v31 }
  0xe8   :  { %373 = vst [vmem:[#allocation5 + $0x8] sm:$0xff] %v361_v32   ;;  %v208_v35 = vsel %vm202_vm2, 0.0, %v207_v33 }
  0xe9   :  { %v217_v36 = vmul.f32 0.85, %v208_v35  ;;  %v220_v37 = vmul.f32 0.9, %v210_v34  ;;  %vm213_vm3 = vcmp.gt.f32.partialorder %v208_v35, 1.0 }
  0xea   :  { %v333_v43 = vsel %vm213_vm3, 1.0, %v438_v28 }
  0xeb   :  { %v218_v38 = vadd.f32 %v217_v36, %v210_v34  ;;  %v221_v39 = vadd.f32 %v220_v37, %v139_v15 }
  0xed   :  { %v219_v40 = vsel %vm213_vm3, 0.0, %v218_v38  ;;  %v231_v41 = vmul.f32 0.9, %v221_v39 }
  0xee   :  { %vm224_vm4 = vcmp.gt.f32.partialorder %v219_v40, 1.0  ;;  %v228_v42 = vmul.f32 0.85, %v219_v40 }
  0xef   :  { %v334_v44 = vsel %vm224_vm4, 1.0, %v438_v28  ;;  %v232_v45 = vadd.f32 %v398_v13, %v231_v41 }
  0xf0   :  { %v229_v46 = vadd.f32 %v228_v42, %v221_v39  ;;  %v366_v47 = vpack.c.bf16 %v334_v44, %v333_v43 }
  0xf2   :  { %v230_v48 = vsel %vm224_vm4, 0.0, %v229_v46  ;;  %374 = vst [vmem:[#allocation5 + $0x10] sm:$0xff] %v366_v47  }
  0xf3   :  { %v239_v49 = vmul.f32 0.85, %v230_v48  ;;  %vm235_vm5 = vcmp.gt.f32.partialorder %v230_v48, 1.0 }
  0xf4   :  { %v335_v52 = vsel %vm235_vm5, 1.0, %v438_v28 }
  0xf5   :  { %v240_v50 = vadd.f32 %v239_v49, %v232_v45 }
  0xf7   :  { %v241_v51 = vsel %vm235_vm5, 0.0, %v240_v50 }
  0xf8   :  { %vm246_vm6 = vcmp.gt.f32.partialorder %v241_v51, 1.0 }
  0xf9   :  { %v336_v53 = vsel %vm246_vm6, 1.0, %v438_v28 }
  0xfa   :  { %v371_v54 = vpack.c.bf16 %v336_v53, %v335_v52 }
  0xfc   :  { %375 = vst [vmem:[#allocation5 + $0x18] sm:$0xff] %v371_v54  }
  0xfd   :  { %424 = shalt.err (!%p421_p4)
}
  0xfe   :  { %s425_s4 = scalar_lea.hbm %s509_s2, 512 }
  0xff   :  { %p426_p5 = scmp.ne.s32.totalorder %s509_s2, %s425_s4  ;;  %p429_p6 = scmp.lt.u32.totalorder %s425_s4, %s509_s2 }
 0x101   :  { %p431_p7 = pnand %p429_p6, %p426_p5 }
 0x103   :  { %434 = shalt.err (!%p431_p7)
}
 0x104   :  { %s440_s9 = smov 64   ;;  %s441_s10 = smov 4  }
 0x105   :  { %316 = dma.vmem_to_hbm [thread:$0]  %s311_s28, 512, %s509_s2, [#allocation6], %s440_s9, %s440_s9, %s441_s10  }
 0x106   :  { %435 = dma.done.wait [#allocation6], 512  }
 0x107   :  { %436 = vsyncadd [#allocation6], 4294966784 }
 0x108   :  { %320 = vsyncpa [#allocation6], 1 }

</bundles_post_ra>
